<compile_context>
chip_gen: v5e
topology: v5e:2x2
jax: 0.10.0
libtpu: 0.0.40
codegen_flags: <defaults>
</compile_context>

<pallas_src>
import functools

import jax
import jax.numpy as jnp
from jax.experimental import pallas as pl
from jax.experimental.pallas import tpu as pltpu

_LANES = 128


def _round_up(x, m):
    return ((x + m - 1) // m) * m


def _sublane_packing(dtype):
    # f32 -> 8 rows, bf16 -> 16, (u)int8/fp8 -> 32 (dtype sublane packing).
    itemsize = jnp.dtype(dtype).itemsize
    return 8 * max(1, 4 // max(1, itemsize))


@functools.lru_cache(maxsize=1)
def _tpu_config():
    """Returns (num_splits, max_block_rows, split_axis_semantics) per chip."""
    try:
        kind = jax.devices()[0].device_kind.lower()
    except Exception:
        kind = ""
    if "v7" in kind:        # 2 TensorCores/chip, ~3.2 TB/s HBM, 64 MiB VMEM
        return 2, 8192, getattr(pltpu, "CORE_PARALLEL", "parallel")
    if "v6" in kind:        # single TC, ~1.4 TB/s HBM
        return 1, 4096, "arbitrary"
    if "v5p" in kind or "v4" in kind:   # megacore: 2 TCs behind "parallel"
        return 2, 2048, "parallel"
    return 1, 2048, "arbitrary"         # v5e / unknown: conservative


def _wasserstein_kernel(real_ref, fake_ref, out_ref, *,
                        rows_valid, block_rows, blocks_per_split):
    """Accumulate per-split partial sums of fake, real and real^2.

    out_ref: f32[3, 8, 128] resident accumulator block (split dim squeezed)
             [0] -> sum(fake), [1] -> sum(real), [2] -> sum(real^2)
    """
    c = pl.program_id(0)   # split (across TCs on multi-core chips)
    i = pl.program_id(1)   # row-block within the split ("arbitrary")

    @pl.when(i == 0)
    def _init():
        out_ref[...] = jnp.zeros_like(out_ref)

    # Global row offset this block *intends* to cover. The index_map clamps
    # fully out-of-range (duplicate) blocks to the last valid one; those and
    # the partial edge block take the masked slow path below.
    row0 = (c * blocks_per_split + i) * block_rows
    needs_mask = row0 + block_rows > rows_valid

    def _accumulate(f, r):
        # Partial-reduce (block_rows, 128) -> (8, 128) with pure VPU adds;
        # the reshape keeps (8, 128) tiles intact so it is layout-free.
        f3 = f.reshape(block_rows // 8, 8, _LANES)
        r3 = r.reshape(block_rows // 8, 8, _LANES)
        out_ref[0] += jnp.sum(f3, axis=0)
        out_ref[1] += jnp.sum(r3, axis=0)
        out_ref[2] += jnp.sum(r3 * r3, axis=0)

    @pl.when(jnp.logical_not(needs_mask))
    def _fast():
        # Interior blocks: fully valid, no iota / compare / select work.
        _accumulate(fake_ref[...].astype(jnp.float32),
                    real_ref[...].astype(jnp.float32))

    @pl.when(needs_mask)
    def _edge():
        # Partial edge block (garbage padding rows) or clamped duplicate
        # block (all rows out of range): zero the invalid contribution.
        row_ids = row0 + jax.lax.broadcasted_iota(
            jnp.int32, (block_rows, _LANES), 0)
        mask = row_ids < rows_valid
        _accumulate(jnp.where(mask, fake_ref[...].astype(jnp.float32), 0.0),
                    jnp.where(mask, real_ref[...].astype(jnp.float32), 0.0))


def _prep(x):
    """View x as (rows, 128) plus a <128-element remainder. No jnp.pad: the
    remainder is handled in the JAX epilogue so no full HBM copy is made."""
    n = x.size
    flat = jnp.ravel(x)
    n_main = (n // _LANES) * _LANES
    if n_main == 0:
        return None, flat
    if n_main == n:
        return flat.reshape(n // _LANES, _LANES), None
    return flat[:n_main].reshape(n_main // _LANES, _LANES), flat[n_main:]


@functools.partial(jax.jit, static_argnames=("drift",))
def wasserstein_distance(real_data, fake_data, drift=0.001):
    # NOTE: unequal real/fake element counts are not supported by this kernel
    # (both tensors share one grid and one mask). If ever needed, run two
    # separate reductions instead.
    assert real_data.size == fake_data.size, "real/fake must have equal size"
    n_real = real_data.size
    n_fake = fake_data.size

    real2d, real_tail = _prep(real_data)
    fake2d, fake_tail = _prep(fake_data)

    sum_fake = jnp.float32(0.0)
    sum_real = jnp.float32(0.0)
    sum_real_sq = jnp.float32(0.0)

    if real2d is not None:
        cfg_splits, max_block_rows, split_sem = _tpu_config()
        rows = real2d.shape[0]

        # Round the block row count up to the dtype's sublane packing so
        # sub-32-bit inputs keep a legal min-tile.
        packing = max(_sublane_packing(real2d.dtype),
                      _sublane_packing(fake2d.dtype))
        block_rows = min(max_block_rows, _round_up(rows, packing))

        n_blocks = pl.cdiv(rows, block_rows)
        num_splits = min(cfg_splits, n_blocks)
        blocks_per_split = pl.cdiv(n_blocks, num_splits)

        def in_index_map(c, i):
            b = c * blocks_per_split + i
            # Clamp so a block is never fully out of bounds; the in-kernel
            # masked path zeroes the duplicated block's contribution.
            return (jnp.minimum(b, n_blocks - 1), 0)

        kernel = functools.partial(
            _wasserstein_kernel,
            rows_valid=rows, block_rows=block_rows,
            blocks_per_split=blocks_per_split)

        # Explicit scoped-VMEM budget: 2 inputs x 2 pipeline buffers x block
        # bytes, plus margin for the accumulator block / internal scratch.
        in_bytes = (jnp.dtype(real2d.dtype).itemsize
                    + jnp.dtype(fake2d.dtype).itemsize)
        vmem_limit = int(2 * block_rows * _LANES * in_bytes + (4 << 20))

        dim_sem = (split_sem if num_splits > 1 else "arbitrary", "arbitrary")

        partial_sums = pl.pallas_call(
            kernel,
            out_shape=jax.ShapeDtypeStruct((num_splits, 3, 8, _LANES),
                                           jnp.float32),
            grid_spec=pltpu.PrefetchScalarGridSpec(
                num_scalar_prefetch=0,
                grid=(num_splits, blocks_per_split),
                in_specs=[
                    pl.BlockSpec((block_rows, _LANES), in_index_map),
                    pl.BlockSpec((block_rows, _LANES), in_index_map),
                ],
                out_specs=pl.BlockSpec((None, 3, 8, _LANES),
                                       lambda c, i: (c, 0, 0, 0)),
            ),
            compiler_params=pltpu.CompilerParams(
                dimension_semantics=dim_sem,
                vmem_limit_bytes=vmem_limit),
        )(real2d, fake2d)

        # Combine per-split (8, 128) partials.
        sums = jnp.sum(partial_sums, axis=(0, 2, 3))
        sum_fake = sums[0]
        sum_real = sums[1]
        sum_real_sq = sums[2]

    if real_tail is not None:
        rt = real_tail.astype(jnp.float32)
        ft = fake_tail.astype(jnp.float32)
        sum_fake = sum_fake + jnp.sum(ft)
        sum_real = sum_real + jnp.sum(rt)
        sum_real_sq = sum_real_sq + jnp.sum(rt * rt)

    mean_fake = sum_fake / jnp.float32(n_fake)
    mean_real = sum_real / jnp.float32(n_real)
    mean_real_sq = sum_real_sq / jnp.float32(n_real)
    return mean_fake - mean_real + jnp.float32(drift) * mean_real_sq


if __name__ == "__main__":
    key = jax.random.PRNGKey(0)
    k_real, k_fake = jax.random.split(key)

    # NCHW inputs, small shapes.
    real = jax.random.normal(k_real, (2, 4, 16, 16), dtype=jnp.float32)
    fake = jax.random.normal(k_fake, (2, 4, 16, 16), dtype=jnp.float32)

    drift = 0.001
    result = wasserstein_distance(real, fake, drift=drift)
    result = jax.block_until_ready(result)

    # Pure-JAX reference check.
    ref = (jnp.mean(fake) - jnp.mean(real)
           + drift * jnp.mean(real ** 2)).astype(jnp.float32)
    assert jnp.allclose(result, ref, atol=1e-5, rtol=1e-5), (result, ref)

    print("KERNEL_OK")
</pallas_src>

<mosaic_0001>
module attributes {stable_mosaic.version = 11 : i64} {
  func.func @_wasserstein_kernel(%arg0: i32, %arg1: i32, %arg2: memref<16x128xf32, #tpu.memory_space<vmem>>, %arg3: memref<16x128xf32, #tpu.memory_space<vmem>>, %arg4: memref<1x3x8x128xf32, #tpu.memory_space<vmem>>) attributes {dimension_semantics = [#tpu.dimension_semantics<arbitrary>, #tpu.dimension_semantics<arbitrary>], iteration_bounds = array<i64: 1, 1>, scalar_prefetch = 0 : i64, scratch_operands = 0 : i64, tpu.core_type = #tpu.core_type<tc>, window_params = [{transform_indices = @transform_0, window_bounds = array<i64: 16, 128>}, {transform_indices = @transform_1, window_bounds = array<i64: 16, 128>}, {transform_indices = @transform_2, window_bounds = array<i64: 1, 3, 8, 128>}]} {
    %c0_i32 = arith.constant 0 : i32
    %0 = arith.cmpi eq, %arg1, %c0_i32 : i32
    %1 = arith.extui %0 : i1 to i32
    %c0_i32_0 = arith.constant 0 : i32
    %2 = arith.cmpi ne, %1, %c0_i32_0 : i32
    scf.if %2 {
      %cst = arith.constant 0.000000e+00 : f32
      %13 = vector.broadcast %cst : f32 to vector<3x8x128xf32>
      %c0 = arith.constant 0 : index
      %c0_5 = arith.constant 0 : index
      %c0_6 = arith.constant 0 : index
      %c0_7 = arith.constant 0 : index
      %14 = vector.load %arg4[%c0, %c0_5, %c0_6, %c0_7] : memref<1x3x8x128xf32, #tpu.memory_space<vmem>>, vector<1x3x8x128xf32>
      %15 = vector.shape_cast %14 : vector<1x3x8x128xf32> to vector<3x8x128xf32>
      %16 = vector.shape_cast %13 : vector<3x8x128xf32> to vector<1x3x8x128xf32>
      tpu.vector_store %arg4[%c0, %c0_5, %c0_6, %c0_7], %16 {strides = array<i32>} : memref<1x3x8x128xf32, #tpu.memory_space<vmem>>, vector<1x3x8x128xf32>,
    } else {
    }
    %c1_i32 = arith.constant 1 : i32
    %3 = arith.muli %arg0, %c1_i32 : i32
    %4 = arith.addi %3, %arg1 : i32
    %c16_i32 = arith.constant 16 : i32
    %5 = arith.muli %4, %c16_i32 : i32
    %c16_i32_1 = arith.constant 16 : i32
    %6 = arith.addi %5, %c16_i32_1 : i32
    %c16_i32_2 = arith.constant 16 : i32
    %7 = arith.cmpi sgt, %6, %c16_i32_2 : i32
    %true = arith.constant true
    %8 = arith.xori %7, %true : i1
    %9 = arith.extui %8 : i1 to i32
    %c0_i32_3 = arith.constant 0 : i32
    %10 = arith.cmpi ne, %9, %c0_i32_3 : i32
    scf.if %10 {
      %c0 = arith.constant 0 : index
      %c0_5 = arith.constant 0 : index
      %13 = vector.load %arg3[%c0, %c0_5] : memref<16x128xf32, #tpu.memory_space<vmem>>, vector<16x128xf32>
      %c0_6 = arith.constant 0 : index
      %c0_7 = arith.constant 0 : index
      %14 = vector.load %arg2[%c0_6, %c0_7] : memref<16x128xf32, #tpu.memory_space<vmem>>, vector<16x128xf32>
      %15 = vector.shape_cast %13 : vector<16x128xf32> to vector<2x8x128xf32>
      %16 = vector.shape_cast %14 : vector<16x128xf32> to vector<2x8x128xf32>
      %c0_8 = arith.constant 0 : index
      %c0_9 = arith.constant 0 : index
      %c0_10 = arith.constant 0 : index
      %c0_11 = arith.constant 0 : index
      %17 = vector.load %arg4[%c0_8, %c0_9, %c0_10, %c0_11] : memref<1x3x8x128xf32, #tpu.memory_space<vmem>>, vector<1x1x8x128xf32>
      %18 = vector.shape_cast %17 : vector<1x1x8x128xf32> to vector<8x128xf32>
      %cst = arith.constant dense<0.000000e+00> : vector<8x128xf32>
      %19 = vector.multi_reduction <add>, %15, %cst [0] : vector<2x8x128xf32> to vector<8x128xf32>
      %20 = arith.addf %18, %19 : vector<8x128xf32>
      %c0_12 = arith.constant 0 : index
      %c0_13 = arith.constant 0 : index
      %c0_14 = arith.constant 0 : index
      %c0_15 = arith.constant 0 : index
      %21 = vector.load %arg4[%c0_12, %c0_13, %c0_14, %c0_15] : memref<1x3x8x128xf32, #tpu.memory_space<vmem>>, vector<1x1x8x128xf32>
      %22 = vector.shape_cast %21 : vector<1x1x8x128xf32> to vector<8x128xf32>
      %23 = vector.shape_cast %20 : vector<8x128xf32> to vector<1x1x8x128xf32>
      tpu.vector_store %arg4[%c0_12, %c0_13, %c0_14, %c0_15], %23 {strides = array<i32>} : memref<1x3x8x128xf32, #tpu.memory_space<vmem>>, vector<1x1x8x128xf32>,
      %c0_16 = arith.constant 0 : index
      %c1 = arith.constant 1 : index
      %c0_17 = arith.constant 0 : index
      %c0_18 = arith.constant 0 : index
      %24 = vector.load %arg4[%c0_16, %c1, %c0_17, %c0_18] : memref<1x3x8x128xf32, #tpu.memory_space<vmem>>, vector<1x1x8x128xf32>
      %25 = vector.shape_cast %24 : vector<1x1x8x128xf32> to vector<8x128xf32>
      %cst_19 = arith.constant dense<0.000000e+00> : vector<8x128xf32>
      %26 = vector.multi_reduction <add>, %16, %cst_19 [0] : vector<2x8x128xf32> to vector<8x128xf32>
      %27 = arith.addf %25, %26 : vector<8x128xf32>
      %c0_20 = arith.constant 0 : index
      %c1_21 = arith.constant 1 : index
      %c0_22 = arith.constant 0 : index
      %c0_23 = arith.constant 0 : index
      %28 = vector.load %arg4[%c0_20, %c1_21, %c0_22, %c0_23] : memref<1x3x8x128xf32, #tpu.memory_space<vmem>>, vector<1x1x8x128xf32>
      %29 = vector.shape_cast %28 : vector<1x1x8x128xf32> to vector<8x128xf32>
      %30 = vector.shape_cast %27 : vector<8x128xf32> to vector<1x1x8x128xf32>
      tpu.vector_store %arg4[%c0_20, %c1_21, %c0_22, %c0_23], %30 {strides = array<i32>} : memref<1x3x8x128xf32, #tpu.memory_space<vmem>>, vector<1x1x8x128xf32>,
      %c0_24 = arith.constant 0 : index
      %c2 = arith.constant 2 : index
      %c0_25 = arith.constant 0 : index
      %c0_26 = arith.constant 0 : index
      %31 = vector.load %arg4[%c0_24, %c2, %c0_25, %c0_26] : memref<1x3x8x128xf32, #tpu.memory_space<vmem>>, vector<1x1x8x128xf32>
      %32 = vector.shape_cast %31 : vector<1x1x8x128xf32> to vector<8x128xf32>
      %33 = arith.mulf %16, %16 : vector<2x8x128xf32>
      %cst_27 = arith.constant dense<0.000000e+00> : vector<8x128xf32>
      %34 = vector.multi_reduction <add>, %33, %cst_27 [0] : vector<2x8x128xf32> to vector<8x128xf32>
      %35 = arith.addf %32, %34 : vector<8x128xf32>
      %c0_28 = arith.constant 0 : index
      %c2_29 = arith.constant 2 : index
      %c0_30 = arith.constant 0 : index
      %c0_31 = arith.constant 0 : index
      %36 = vector.load %arg4[%c0_28, %c2_29, %c0_30, %c0_31] : memref<1x3x8x128xf32, #tpu.memory_space<vmem>>, vector<1x1x8x128xf32>
      %37 = vector.shape_cast %36 : vector<1x1x8x128xf32> to vector<8x128xf32>
      %38 = vector.shape_cast %35 : vector<8x128xf32> to vector<1x1x8x128xf32>
      tpu.vector_store %arg4[%c0_28, %c2_29, %c0_30, %c0_31], %38 {strides = array<i32>} : memref<1x3x8x128xf32, #tpu.memory_space<vmem>>, vector<1x1x8x128xf32>,
    } else {
    }
    %11 = arith.extui %7 : i1 to i32
    %c0_i32_4 = arith.constant 0 : i32
    %12 = arith.cmpi ne, %11, %c0_i32_4 : i32
    scf.if %12 {
      %13 = tpu.iota {dimensions = array<i32: 0>} : vector<16x128xi32>
      %14 = vector.broadcast %5 : i32 to vector<16x128xi32>
      %15 = arith.addi %14, %13 : vector<16x128xi32>
      %c16_i32_5 = arith.constant 16 : i32
      %16 = vector.broadcast %c16_i32_5 : i32 to vector<16x128xi32>
      %17 = arith.cmpi slt, %15, %16 : vector<16x128xi32>
      %c0 = arith.constant 0 : index
      %c0_6 = arith.constant 0 : index
      %18 = vector.load %arg3[%c0, %c0_6] : memref<16x128xf32, #tpu.memory_space<vmem>>, vector<16x128xf32>
      %cst = arith.constant 0.000000e+00 : f32
      %19 = vector.broadcast %cst : f32 to vector<16x128xf32>
      %20 = arith.select %17, %18, %19 : vector<16x128xi1>, vector<16x128xf32>
      %c0_7 = arith.constant 0 : index
      %c0_8 = arith.constant 0 : index
      %21 = vector.load %arg2[%c0_7, %c0_8] : memref<16x128xf32, #tpu.memory_space<vmem>>, vector<16x128xf32>
      %cst_9 = arith.constant 0.000000e+00 : f32
      %22 = vector.broadcast %cst_9 : f32 to vector<16x128xf32>
      %23 = arith.select %17, %21, %22 : vector<16x128xi1>, vector<16x128xf32>
      %24 = vector.shape_cast %20 : vector<16x128xf32> to vector<2x8x128xf32>
      %25 = vector.shape_cast %23 : vector<16x128xf32> to vector<2x8x128xf32>
      %c0_10 = arith.constant 0 : index
      %c0_11 = arith.constant 0 : index
      %c0_12 = arith.constant 0 : index
      %c0_13 = arith.constant 0 : index
      %26 = vector.load %arg4[%c0_10, %c0_11, %c0_12, %c0_13] : memref<1x3x8x128xf32, #tpu.memory_space<vmem>>, vector<1x1x8x128xf32>
      %27 = vector.shape_cast %26 : vector<1x1x8x128xf32> to vector<8x128xf32>
      %cst_14 = arith.constant dense<0.000000e+00> : vector<8x128xf32>
      %28 = vector.multi_reduction <add>, %24, %cst_14 [0] : vector<2x8x128xf32> to vector<8x128xf32>
      %29 = arith.addf %27, %28 : vector<8x128xf32>
      %c0_15 = arith.constant 0 : index
      %c0_16 = arith.constant 0 : index
      %c0_17 = arith.constant 0 : index
      %c0_18 = arith.constant 0 : index
      %30 = vector.load %arg4[%c0_15, %c0_16, %c0_17, %c0_18] : memref<1x3x8x128xf32, #tpu.memory_space<vmem>>, vector<1x1x8x128xf32>
      %31 = vector.shape_cast %30 : vector<1x1x8x128xf32> to vector<8x128xf32>
      %32 = vector.shape_cast %29 : vector<8x128xf32> to vector<1x1x8x128xf32>
      tpu.vector_store %arg4[%c0_15, %c0_16, %c0_17, %c0_18], %32 {strides = array<i32>} : memref<1x3x8x128xf32, #tpu.memory_space<vmem>>, vector<1x1x8x128xf32>,
      %c0_19 = arith.constant 0 : index
      %c1 = arith.constant 1 : index
      %c0_20 = arith.constant 0 : index
      %c0_21 = arith.constant 0 : index
      %33 = vector.load %arg4[%c0_19, %c1, %c0_20, %c0_21] : memref<1x3x8x128xf32, #tpu.memory_space<vmem>>, vector<1x1x8x128xf32>
      %34 = vector.shape_cast %33 : vector<1x1x8x128xf32> to vector<8x128xf32>
      %cst_22 = arith.constant dense<0.000000e+00> : vector<8x128xf32>
      %35 = vector.multi_reduction <add>, %25, %cst_22 [0] : vector<2x8x128xf32> to vector<8x128xf32>
      %36 = arith.addf %34, %35 : vector<8x128xf32>
      %c0_23 = arith.constant 0 : index
      %c1_24 = arith.constant 1 : index
      %c0_25 = arith.constant 0 : index
      %c0_26 = arith.constant 0 : index
      %37 = vector.load %arg4[%c0_23, %c1_24, %c0_25, %c0_26] : memref<1x3x8x128xf32, #tpu.memory_space<vmem>>, vector<1x1x8x128xf32>
      %38 = vector.shape_cast %37 : vector<1x1x8x128xf32> to vector<8x128xf32>
      %39 = vector.shape_cast %36 : vector<8x128xf32> to vector<1x1x8x128xf32>
      tpu.vector_store %arg4[%c0_23, %c1_24, %c0_25, %c0_26], %39 {strides = array<i32>} : memref<1x3x8x128xf32, #tpu.memory_space<vmem>>, vector<1x1x8x128xf32>,
      %c0_27 = arith.constant 0 : index
      %c2 = arith.constant 2 : index
      %c0_28 = arith.constant 0 : index
      %c0_29 = arith.constant 0 : index
      %40 = vector.load %arg4[%c0_27, %c2, %c0_28, %c0_29] : memref<1x3x8x128xf32, #tpu.memory_space<vmem>>, vector<1x1x8x128xf32>
      %41 = vector.shape_cast %40 : vector<1x1x8x128xf32> to vector<8x128xf32>
      %42 = arith.mulf %25, %25 : vector<2x8x128xf32>
      %cst_30 = arith.constant dense<0.000000e+00> : vector<8x128xf32>
      %43 = vector.multi_reduction <add>, %42, %cst_30 [0] : vector<2x8x128xf32> to vector<8x128xf32>
      %44 = arith.addf %41, %43 : vector<8x128xf32>
      %c0_31 = arith.constant 0 : index
      %c2_32 = arith.constant 2 : index
      %c0_33 = arith.constant 0 : index
      %c0_34 = arith.constant 0 : index
      %45 = vector.load %arg4[%c0_31, %c2_32, %c0_33, %c0_34] : memref<1x3x8x128xf32, #tpu.memory_space<vmem>>, vector<1x1x8x128xf32>
      %46 = vector.shape_cast %45 : vector<1x1x8x128xf32> to vector<8x128xf32>
      %47 = vector.shape_cast %44 : vector<8x128xf32> to vector<1x1x8x128xf32>
      tpu.vector_store %arg4[%c0_31, %c2_32, %c0_33, %c0_34], %47 {strides = array<i32>} : memref<1x3x8x128xf32, #tpu.memory_space<vmem>>, vector<1x1x8x128xf32>,
    } else {
    }
    return
  }
  func.func @transform_0(%arg0: i32, %arg1: i32) -> (i32, i32) {
    %c1_i32 = arith.constant 1 : i32
    %0 = arith.muli %arg0, %c1_i32 : i32
    %1 = arith.addi %0, %arg1 : i32
    %c0_i32 = arith.constant 0 : i32
    %2 = arith.minsi %1, %c0_i32 : i32
    %c0_i32_0 = arith.constant 0 : i32
    %c0_i32_1 = arith.constant 0 : i32
    return %2, %c0_i32_0 : i32, i32
  }
  func.func @transform_1(%arg0: i32, %arg1: i32) -> (i32, i32) {
    %c1_i32 = arith.constant 1 : i32
    %0 = arith.muli %arg0, %c1_i32 : i32
    %1 = arith.addi %0, %arg1 : i32
    %c0_i32 = arith.constant 0 : i32
    %2 = arith.minsi %1, %c0_i32 : i32
    %c0_i32_0 = arith.constant 0 : i32
    %c0_i32_1 = arith.constant 0 : i32
    return %2, %c0_i32_0 : i32, i32
  }
  func.func @transform_2(%arg0: i32, %arg1: i32) -> (i32, i32, i32, i32) {
    %c0_i32 = arith.constant 0 : i32
    %c0_i32_0 = arith.constant 0 : i32
    %c0_i32_1 = arith.constant 0 : i32
    %c0_i32_2 = arith.constant 0 : i32
    return %arg0, %c0_i32, %c0_i32_0, %c0_i32_1 : i32, i32, i32, i32
  }
}

</mosaic_0001>

<bundles_post_ra>
// kernel: wasserstein_distance.1
= control target key start
LH: loop header
LB: loop body
LE: loop exit
PB: predicated region body
PF: predicated region fallthrough
CT: control target
= control target key end

     0   :  { %s206_s1 = inlined_call_operand.vmem [shape: f32[16,128], index: 1, kind: input, shape index: {}]   ;;  %s207_s0 = inlined_call_operand.vmem [shape: f32[16,128], index: 0, kind: input, shape index: {}]   ;;  %s208_s2 = inlined_call_operand.vmem [shape: f32[1,3,8,128], index: 2, kind: output, shape index: {}]  }
   0x1   :  { %v90_v0 = vld [vmem:[%s206_s1] sm:$0xff]  ;;  %v91_v1 = vld [vmem:[%s206_s1 + $0x8] sm:$0xff] }
   0x2   :  { %v92_v2 = vld [vmem:[%s207_s0] sm:$0xff]  ;;  %v95_v3 = vadd.f32 %v91_v1, %v90_v0  ;;  %v93_v4 = vld [vmem:[%s207_s0 + $0x8] sm:$0xff] }
   0x3   :  { %v105_v5 = vmul.f32 %v92_v2, %v92_v2  ;;  %v100_v6 = vadd.f32 %v93_v4, %v92_v2  ;;  %v106_v7 = vmul.f32 %v93_v4, %v93_v4 }
   0x4   :  { %97 = vst [vmem:[%s208_s2] sm:$0xff] %v95_v3 }
   0x5   :  { %v107_v8 = vadd.f32 %v106_v7, %v105_v5  ;;  %162 = vst [vmem:[%s208_s2 + $0x8] sm:$0xff] %v100_v6 }
   0x7   :  { %164 = vst [vmem:[%s208_s2 + $0x10] sm:$0xff] %v107_v8 }

</bundles_post_ra>
